<compile_context>
chip_gen: v7x
topology: tpu7x:2x2x1
jax: 0.10.0
libtpu: 0.0.40
codegen_flags: <defaults>
</compile_context>

<pallas_src>
import math

import jax
import jax.numpy as jnp
from jax.experimental import pallas as pl
from jax.experimental.pallas import tpu as pltpu


_LANES = 128
_SUBLANES = 8
# 4096 rows * 128 lanes * 4 B = 2 MiB per f32 buffer -> 6 double-buffered
# copies (1 input + 2 big outputs) ~= 12 MiB, comfortably inside 32 MiB.
_MAX_TILE_ROWS = 4096


def _ptmodule_kernel(x_ref, add_ref, mul_ref, psum_ref):
    """One (batch, feature-tile) grid point.

    x_ref / add_ref / mul_ref : (1, R_TILE, 128) VMEM tiles
    psum_ref                  : (1, 1, 8, 128) VMEM tile holding the tile's
                                f32 partial sum of result_add (broadcast).
    """
    i = pl.program_id(0)  # batch index
    x = x_ref[...]

    # Fold "+2" and "+batch_index" into one scalar constant (single VPU add).
    c = (jnp.float32(2.0) + i.astype(jnp.float32)).astype(x.dtype)
    add = x + c
    add_ref[...] = add
    mul_ref[...] = x * jnp.asarray(3.0, x.dtype)

    # Per-tile partial sum in f32; the cross-lane reduce runs on the XLU and is
    # hidden under the DMA-bound critical path.
    s = jnp.sum(add.astype(jnp.float32))
    psum_ref[...] = jnp.full(psum_ref.shape, s, jnp.float32)


def ptmodule_forward(x):
    orig_shape = x.shape
    B = orig_shape[0]
    feat = math.prod(orig_shape[1:])

    # Flatten to lane-dense (B, rows, 128); pad feature dim to a multiple of
    # 8*128 so every tile is (8,128)-aligned (unmasked full-width stores).
    pad = (-feat) % (_SUBLANES * _LANES)
    feat_p = feat + pad
    x_flat = x.reshape(B, feat)
    if pad:
        x_flat = jnp.pad(x_flat, ((0, 0), (0, pad)))
    rows = feat_p // _LANES
    x3 = x_flat.reshape(B, rows, _LANES)

    # Feature tiling: largest row-tile (multiple of 8) that divides `rows`,
    # capped by the VMEM budget above.
    if rows <= _MAX_TILE_ROWS:
        r_tile = rows
    else:
        r_tile = _MAX_TILE_ROWS
        while rows % r_tile != 0:
            r_tile -= _SUBLANES
    n_row_tiles = rows // r_tile

    out_shapes = (
        jax.ShapeDtypeStruct((B, rows, _LANES), x.dtype),    # result_add (padded)
        jax.ShapeDtypeStruct((B, rows, _LANES), x.dtype),    # result_mul (padded)
        jax.ShapeDtypeStruct((B, n_row_tiles, _SUBLANES, _LANES), jnp.float32),
    )
    grid_spec = pltpu.PrefetchScalarGridSpec(
        num_scalar_prefetch=0,
        grid=(B, n_row_tiles),
        in_specs=[
            pl.BlockSpec((1, r_tile, _LANES), lambda i, j: (i, j, 0)),
        ],
        out_specs=[
            pl.BlockSpec((1, r_tile, _LANES), lambda i, j: (i, j, 0)),
            pl.BlockSpec((1, r_tile, _LANES), lambda i, j: (i, j, 0)),
            pl.BlockSpec((1, 1, _SUBLANES, _LANES), lambda i, j: (i, j, 0, 0)),
        ],
    )
    add3, mul3, psums = pl.pallas_call(
        _ptmodule_kernel,
        out_shape=out_shapes,
        grid_spec=grid_spec,
        compiler_params=pltpu.CompilerParams(
            # No cross-step carries: every grid point writes disjoint blocks,
            # so both axes are parallel (enables megacore sharding on v7x).
            dimension_semantics=("parallel", "parallel"),
            vmem_limit_bytes=32 * 1024 * 1024,
        ),
    )(x3)

    add_flat = add3.reshape(B, feat_p)
    mul_flat = mul3.reshape(B, feat_p)
    if pad:
        add_flat = add_flat[:, :feat]
        mul_flat = mul_flat[:, :feat]
    result_add = add_flat.reshape(orig_shape)
    result_mul = mul_flat.reshape(orig_shape)

    # Finish the mean on the tiny partial-sum tensor. Each padded (zero) input
    # element contributed (2 + batch_index) to the kernel sums; remove that
    # analytically with statically-known Python ints.
    total = jnp.sum(psums[:, :, 0, 0])
    pad_correction = float(pad) * (2.0 * B + B * (B - 1) / 2.0)
    mean_result = (total - jnp.float32(pad_correction)) / jnp.float32(B * feat)
    return result_add, result_mul, mean_result


if __name__ == "__main__":
    key = jax.random.PRNGKey(0)
    B, C, H, W = 2, 4, 16, 16
    x = jax.random.normal(key, (B, C, H, W), dtype=jnp.float32)

    result_add, result_mul, mean_result = ptmodule_forward(x)
    jax.block_until_ready((result_add, result_mul, mean_result))

    # Reference check in plain JAX (mirrors the PyTorch forward).
    ref_add = x + 2.0 + jnp.arange(B, dtype=x.dtype)[:, None, None, None]
    ref_mul = x * 3.0
    ref_mean = jnp.mean(ref_add)

    assert jnp.allclose(result_add, ref_add, atol=1e-5, rtol=1e-5)
    assert jnp.allclose(result_mul, ref_mul, atol=1e-5, rtol=1e-5)
    assert jnp.allclose(mean_result, ref_mean, atol=1e-5, rtol=1e-5)

    print("KERNEL_OK")
</pallas_src>

<mosaic_0001>
module attributes {stable_mosaic.version = 11 : i64} {
  func.func @_ptmodule_kernel(%arg0: i32, %arg1: i32, %arg2: memref<1x8x128xf32, #tpu.memory_space<vmem>>, %arg3: memref<1x8x128xf32, #tpu.memory_space<vmem>>, %arg4: memref<1x8x128xf32, #tpu.memory_space<vmem>>, %arg5: memref<1x1x8x128xf32, #tpu.memory_space<vmem>>) attributes {dimension_semantics = [#tpu.dimension_semantics<parallel>, #tpu.dimension_semantics<parallel>], iteration_bounds = array<i64: 2, 1>, scalar_prefetch = 0 : i64, scratch_operands = 0 : i64, tpu.core_type = #tpu.core_type<tc>, window_params = [{transform_indices = @transform_0, window_bounds = array<i64: 1, 8, 128>}, {transform_indices = @transform_1, window_bounds = array<i64: 1, 8, 128>}, {transform_indices = @transform_2, window_bounds = array<i64: 1, 8, 128>}, {transform_indices = @transform_3, window_bounds = array<i64: 1, 1, 8, 128>}]} {
    %c0 = arith.constant 0 : index
    %c0_0 = arith.constant 0 : index
    %c0_1 = arith.constant 0 : index
    %0 = vector.load %arg2[%c0, %c0_0, %c0_1] : memref<1x8x128xf32, #tpu.memory_space<vmem>>, vector<1x8x128xf32>
    %1 = arith.sitofp %arg0 : i32 to f32
    %cst = arith.constant 2.000000e+00 : f32
    %2 = arith.addf %cst, %1 : f32
    %3 = vector.broadcast %2 : f32 to vector<1x8x128xf32>
    %4 = arith.addf %0, %3 : vector<1x8x128xf32>
    %c0_2 = arith.constant 0 : index
    %c0_3 = arith.constant 0 : index
    %c0_4 = arith.constant 0 : index
    %5 = vector.load %arg3[%c0_2, %c0_3, %c0_4] : memref<1x8x128xf32, #tpu.memory_space<vmem>>, vector<1x8x128xf32>
    tpu.vector_store %arg3[%c0_2, %c0_3, %c0_4], %4 {strides = array<i32>} : memref<1x8x128xf32, #tpu.memory_space<vmem>>, vector<1x8x128xf32>,
    %cst_5 = arith.constant 3.000000e+00 : f32
    %6 = vector.broadcast %cst_5 : f32 to vector<1x8x128xf32>
    %7 = arith.mulf %0, %6 : vector<1x8x128xf32>
    %c0_6 = arith.constant 0 : index
    %c0_7 = arith.constant 0 : index
    %c0_8 = arith.constant 0 : index
    %8 = vector.load %arg4[%c0_6, %c0_7, %c0_8] : memref<1x8x128xf32, #tpu.memory_space<vmem>>, vector<1x8x128xf32>
    tpu.vector_store %arg4[%c0_6, %c0_7, %c0_8], %7 {strides = array<i32>} : memref<1x8x128xf32, #tpu.memory_space<vmem>>, vector<1x8x128xf32>,
    %9 = vector.shape_cast %4 : vector<1x8x128xf32> to vector<1x1x8x128xf32>
    %cst_9 = arith.constant dense<0.000000e+00> : vector<1xf32>
    %10 = vector.multi_reduction <add>, %9, %cst_9 [1, 2, 3] : vector<1x1x8x128xf32> to vector<1xf32>
    %11 = vector.shape_cast %10 : vector<1xf32> to vector<1x1x1x1xf32>
    %12 = vector.extract %11[0, 0, 0, 0] : f32 from vector<1x1x1x1xf32>
    %13 = vector.broadcast %12 : f32 to vector<1x1x8x128xf32>
    %c0_10 = arith.constant 0 : index
    %c0_11 = arith.constant 0 : index
    %c0_12 = arith.constant 0 : index
    %c0_13 = arith.constant 0 : index
    %14 = vector.load %arg5[%c0_10, %c0_11, %c0_12, %c0_13] : memref<1x1x8x128xf32, #tpu.memory_space<vmem>>, vector<1x1x8x128xf32>
    tpu.vector_store %arg5[%c0_10, %c0_11, %c0_12, %c0_13], %13 {strides = array<i32>} : memref<1x1x8x128xf32, #tpu.memory_space<vmem>>, vector<1x1x8x128xf32>,
    return
  }
  func.func @transform_0(%arg0: i32, %arg1: i32) -> (i32, i32, i32) {
    %c0_i32 = arith.constant 0 : i32
    %c0_i32_0 = arith.constant 0 : i32
    return %arg0, %arg1, %c0_i32 : i32, i32, i32
  }
  func.func @transform_1(%arg0: i32, %arg1: i32) -> (i32, i32, i32) {
    %c0_i32 = arith.constant 0 : i32
    %c0_i32_0 = arith.constant 0 : i32
    return %arg0, %arg1, %c0_i32 : i32, i32, i32
  }
  func.func @transform_2(%arg0: i32, %arg1: i32) -> (i32, i32, i32) {
    %c0_i32 = arith.constant 0 : i32
    %c0_i32_0 = arith.constant 0 : i32
    return %arg0, %arg1, %c0_i32 : i32, i32, i32
  }
  func.func @transform_3(%arg0: i32, %arg1: i32) -> (i32, i32, i32, i32) {
    %c0_i32 = arith.constant 0 : i32
    %c0_i32_0 = arith.constant 0 : i32
    %c0_i32_1 = arith.constant 0 : i32
    return %arg0, %arg1, %c0_i32, %c0_i32_0 : i32, i32, i32, i32
  }
}

</mosaic_0001>

<bundles_post_ra>
// kernel: tpu_custom_call.1
= control target key start
LH: loop header
LB: loop body
LE: loop exit
PB: predicated region body
PF: predicated region fallthrough
CT: control target
= control target key end

     0   :  { %9 = vsyncpa [#allocation3], 0  ;;  %s982_s0 = inlined_call_operand.hbm [shape: f32[2,8,128], index: 0, kind: input, shape index: {}]   ;;  %s983_s1 = inlined_call_operand.hbm [shape: f32[2,8,128], index: 1, kind: output, shape index: {0}]   ;;  %s984_s2 = inlined_call_operand.hbm [shape: f32[2,8,128], index: 2, kind: output, shape index: {1}]   ;;  %s985_s3 = inlined_call_operand.hbm [shape: f32[2,1,8,128], index: 3, kind: output, shape index: {2}]  }
   0x1   :  { %11 = vsyncpa [#allocation3 + $0x1], 0 }
   0x2   :  { %12 = vsyncpa [#allocation4], 0 }
   0x3   :  { %14 = vsyncpa [#allocation4 + $0x1], 0 }
   0x4   :  { %15 = vsyncpa [#allocation7], 0 }
   0x5   :  { %17 = vsyncpa [#allocation7 + $0x1], 0  ;;  %s731_s12 = smov 0   ;;  %s733_s13 = smov 0  }
   0x6   :  { %s735_s14 = smov 0   ;;  %s737_s15 = smov 0  }
   0x7   :  { %s739_s16 = smov 0   ;;  %s741_s17 = smov 0  }
   0x8 LB: > { %s762_s18 = sadd.s32 4294967295, %s705_s17   ;;  %s441_s19 = sadd.s32 4294967294, %s705_s17   ;;  %s705_s17 = sphi %s741_s17, %s23_s17   ;;  %s701_s16 = sphi %s739_s16, %s1001_s16   ;;  %s697_s15 = sphi %s737_s15, %s1000_s15   ;;  %s693_s14 = sphi %s735_s14, %s999_s14   ;;  %s689_s13 = sphi %s733_s13, %s998_s13   ;;  %s685_s12 = sphi %s731_s12, %s997_s12  }
   0x9   : > { %s35_s20 = sadd.s32 1, %s701_s16  ;;  %s44_s21 = sadd.s32 1, %s693_s14 }
   0xa   : > { %p37_p0 = scmp.ge.s32.totalorder %s35_s20, 2  ;;  %p51_p1 = scmp.ne.s32.totalorder %s693_s14, %s689_s13 }
   0xb   : > { %p52_p2 = scmp.eq.s32.totalorder %s705_s17, 0  ;;  %p57_p3 = scmp.ne.s32.totalorder %s689_s13, %s685_s12 }
   0xc   : > { %s1003_s20 = smov (%p37_p0, %s35_s20), 0  ;;  %p58_p5 = scmp.eq.s32.totalorder %s762_s18, 0 }
   0xd   : > { %p774_p4 = por %p52_p2, %p51_p1  ;;  %s39_s23 = ssub.s32 %s701_s16, %s1003_s20 }
   0xe   : > { %p83_p6 = scmp.eq.s32.totalorder %s762_s18, 1  ;;  %p42_p7 = scmp.eq.s32.totalorder %s39_s23, 0 }
   0xf   : > { %p782_p8 = por %p58_p5, %p57_p3  ;;  %p89_p10 = scmp.eq.s32.totalorder %s441_s19, 1 }
  0x10   : > { %p786_p9 = por %p83_p6, %p51_p1  ;;  %p483_p13 = scmp.lt.s32.totalorder %s705_s17, 2 }
  0x11   : > { %s793_s26 = scalar_select %p42_p7, %s693_s14, %s44_s21  }
  0x12   : > { %s989_s25 = scalar_select %p786_p9, 1, 0 }
  0x13   : > { %p795_p11 = por %p89_p10, %p57_p3  ;;  %s165_s28 = sand.u32 1, %s693_s14  }
  0x14   : > { %s444_s29 = sshll.u32 %s165_s28, 3  ;;  %s445_s30 = sshll.u32 %s701_s16, 7 }
  0x15   : > { %s990_s27 = scalar_select %p795_p11, 1, 0 }
  0x16   : > { %s806_s6 = scalar_lea.hbm %s982_s0, %s445_s30  ;;  %s169_s7 = scalar_lea.vmem [#allocation2], %s444_s29 }
  0x17   : > { %s177_s8 = sshll.u32 %s169_s7, 4  ;;  %p812_p0 = pnand %p483_p13, %p774_p4  ;;  %s808_s8 = int_to_ptr.vmem [resolvable:$true] %s177_s8 }
  0x18   : > { %s166_s10 = scalar_lea.sflag [#allocation3], %s165_s28  ;;  %s533_s11 = scalar_lea.hbm %s806_s6, 128 }
  0x19   : > { %p534_p3 = scmp.ne.s32.totalorder %s806_s6, %s533_s11  ;;  %p535_p5 = pneg %p812_p0 }
  0x1a   : > { %s538_s22 = scalar_lea.hbm %s982_s0, 256  ;;  %p539_p4 = scmp.lt.u32.totalorder %s806_s6, %s982_s0 }
  0x1b   : > { %p536_p6 = pnand %p535_p5, %p534_p3  ;;  %p540_p10 = scmp.lt.u32.totalorder %s538_s22, %s533_s11 }
  0x1c   : > { %p542_p12 = scmp.lt.u32.totalorder %s533_s11, %s806_s6 }
  0x1d   : > { %p537_p7 = pneg %p536_p6  ;;  %p541_p13 = por %p540_p10, %p539_p4 }
  0x1f   : > { %p543_p1 = por %p542_p12, %p541_p13 }
  0x21   : > { %p544_p2 = pnand %p543_p1, %p537_p7 }
  0x23   : > { %547 = shalt.err (!%p544_p2)
}
  0x24   : > { %s548_s28 = scalar_lea.vmem %s808_s8, 128  ;;  %s707_s4 = smov [#allocation2]  }
  0x25   : > { %p549_p3 = scmp.ne.s32.totalorder %s808_s8, %s548_s28  ;;  %s553_s5 = sshll.u32 %s707_s4, 4  ;;  %s554_s5 = int_to_ptr.vmem [resolvable:$false] %s553_s5 }
  0x26   : > { %s555_s7 = scalar_lea.vmem %s554_s5, 256  ;;  %p556_p9 = scmp.lt.s32.totalorder %s808_s8, %s554_s5 }
  0x27   : > { %p551_p6 = pnand %p549_p3, %p535_p5  ;;  %p557_p4 = scmp.lt.s32.totalorder %s555_s7, %s548_s28 }
  0x29   : > { %p552_p11 = pneg %p551_p6  ;;  %p558_p10 = por %p557_p4, %p556_p9 }
  0x2b   : > { %p559_p12 = pnand %p558_p10, %p552_p11 }
  0x2d   : > { %562 = shalt.err (!%p559_p12)
}
  0x2e   : > { %472 = dma.hbm_to_vmem [thread:$0]  (!%p812_p0), %s806_s6, 128, %s808_s8, %s166_s10  }
  0x2f   : > { %p992_p1 = scmp.lt.s32.totalorder %s705_s17, 3  ;;  %p993_p2 = scmp.ge.s32.totalorder %s705_s17, 1 }
  0x31   : > { %p183_p5 = pnand %p993_p2, %p992_p1 }
  0x32   : > { %s848_s11 = sand.u32 (!%p183_p5), 1, %s689_s13  }
  0x33   : > { %186 = sbr.rel (%p183_p5) target bundleno = 285 (0x11d), region = 24  ;;  %s851_s21 = sshll.u32 (!%p183_p5), %s848_s11, 3 }
  0x34   : > { %s189_s23 = scalar_lea.sflag (!%p183_p5), [#allocation3], %s848_s11  ;;  %s192_s9 = scalar_lea.vmem (!%p183_p5), [#allocation2], %s851_s21 }
  0x3a   : > { %672 = dma.done.wait (%p782_p8), %s189_s23, 128  }
  0x3b   : > { %674 = vsyncadd (%p782_p8), %s189_s23, 4294967168  ;;  %s226_s6 = scvt.s32.f32 %s697_s15  ;;  %v225_v1 = vld [vmem:[%s192_s9] sm:$0xff]  ;;  %s217_s10 = scalar_lea.vmem [#allocation6], %s851_s21 }
  0x3c   : > { %v231_v3 = vmul.f32 3.0, %v225_v1  ;;  %s249_s22 = sand.u32 1, %s762_s18   ;;  %s863_s29 = sshll.u32 %s697_s15, 7 }
  0x3d   : > { %s227_s8 = sadd.f32 2.0, %s226_s6  ;;  %s869_s28 = scalar_lea.hbm %s984_s2, %s863_s29 }
  0x3e   : > { %232 = vst [vmem:[%s217_s10] sm:$0xff] %v231_v3  ;;  %s283_s4 = sshll.u32 %s217_s10, 4  ;;  %s210_s5 = scalar_lea.vmem [#allocation5], %s851_s21  ;;  %s871_s4 = int_to_ptr.vmem [resolvable:$true] %s283_s4 }
  0x3f   : > { %v228_v0 = vstv %s227_s8  ;;  %s876_s7 = scalar_lea.sflag [#allocation7], %s249_s22  ;;  %s563_s18 = scalar_lea.vmem %s871_s4, 128 }
  0x40   : > { %v229_v2 = vadd.f32 %v228_v0, %v225_v1  ;;  %p564_p8 = scmp.ne.s32.totalorder %s871_s4, %s563_s18  ;;  %p994_p9 = scmp.ne.s32.totalorder %s989_s25, 0 }
  0x41   : > { %s708_s15 = smov [#allocation6]  }
  0x42   : > { %233 = vadd.xlane.f32.xlu0 %v229_v2  ;;  %230 = vst [vmem:[%s210_s5] sm:$0xff] %v229_v2  ;;  %p565_p11 = pnand %p564_p8, %p994_p9  ;;  %s567_s23 = sshll.u32 %s708_s15, 4  ;;  %s568_s23 = int_to_ptr.vmem [resolvable:$false] %s567_s23 }
  0x43   : > { %s569_s9 = scalar_lea.vmem %s568_s23, 256  ;;  %p570_p7 = scmp.lt.s32.totalorder %s871_s4, %s568_s23 }
  0x44   : > { %p566_p0 = pneg %p565_p11  ;;  %p571_p13 = scmp.lt.s32.totalorder %s569_s9, %s563_s18 }
  0x46   : > { %p572_p3 = por %p571_p13, %p570_p7 }
  0x48   : > { %p573_p6 = pnand %p572_p3, %p566_p0 }
  0x4a   : > { %576 = shalt.err (!%p573_p6)
}
  0x4b   : > { %s577_s6 = scalar_lea.hbm %s869_s28, 128  ;;  %s581_s22 = scalar_lea.hbm %s984_s2, 256 }
  0x4c   : > { %p578_p4 = scmp.ne.s32.totalorder %s869_s28, %s577_s6  ;;  %p582_p1 = scmp.lt.u32.totalorder %s869_s28, %s984_s2 }
  0x4d   : > { %p583_p2 = scmp.lt.u32.totalorder %s581_s22, %s577_s6  ;;  %p585_p8 = scmp.lt.u32.totalorder %s577_s6, %s869_s28 }
  0x4e   : > { %p579_p10 = pnand %p578_p4, %p994_p9 }
  0x4f   : > { %p584_p5 = por %p583_p2, %p582_p1 }
  0x50   : > { %p580_p12 = pneg %p579_p10 }
  0x51   : > { %p586_p11 = por %p585_p8, %p584_p5 }
  0x53   : > { %p587_p0 = pnand %p586_p11, %p580_p12 }
  0x55   : > { %590 = shalt.err (!%p587_p0)
}
  0x56   : > { %464 = dma.vmem_to_hbm [thread:$0]  (%p994_p9), %s871_s4, 128, %s869_s28, %s876_s7  }
  0x57   : > { %s904_s23 = scalar_lea.hbm %s983_s1, %s863_s29  ;;  %s269_s9 = sshll.u32 %s210_s5, 4  ;;  %s270_s9 = int_to_ptr.vmem [resolvable:$true] %s269_s9 }
  0x58   : > { %s245_s6 = scalar_lea.sflag [#allocation4], %s848_s11  ;;  %s591_s8 = scalar_lea.vmem %s270_s9, 128 }
  0x59   : > { %p592_p7 = scmp.ne.s32.totalorder %s270_s9, %s591_s8  ;;  %s709_s10 = smov [#allocation5]  }
  0x5a   : > { %s595_s22 = sshll.u32 %s709_s10, 4  ;;  %s596_s22 = int_to_ptr.vmem [resolvable:$false] %s595_s22 }
  0x5b   : > { %p593_p13 = pnand %p592_p7, %p994_p9  ;;  %s597_s24 = scalar_lea.vmem %s596_s22, 256 }
  0x5c   : > { %p598_p6 = scmp.lt.s32.totalorder %s270_s9, %s596_s22  ;;  %p599_p4 = scmp.lt.s32.totalorder %s597_s24, %s591_s8 }
  0x5d   : > { %p594_p3 = pneg %p593_p13 }
  0x5e   : > { %p600_p10 = por %p599_p4, %p598_p6 }
  0x60   : > { %p601_p12 = pnand %p600_p10, %p594_p3 }
  0x62   : > { %604 = shalt.err (!%p601_p12)
}
  0x63   : > { %s605_s11 = scalar_lea.hbm %s904_s23, 128  ;;  %s609_s5 = scalar_lea.hbm %s983_s1, 256 }
  0x64   : > { %p606_p1 = scmp.ne.s32.totalorder %s904_s23, %s605_s11  ;;  %p610_p8 = scmp.lt.u32.totalorder %s904_s23, %s983_s1 }
  0x65   : > { %p611_p11 = scmp.lt.u32.totalorder %s609_s5, %s605_s11  ;;  %p613_p7 = scmp.lt.u32.totalorder %s605_s11, %s904_s23 }
  0x66   : > { %p607_p2 = pnand %p606_p1, %p994_p9 }
  0x67   : > { %p612_p0 = por %p611_p11, %p610_p8 }
  0x68   : > { %p608_p5 = pneg %p607_p2 }
  0x69   : > { %p614_p13 = por %p613_p7, %p612_p0 }
  0x6b   : > { %p615_p3 = pnand %p614_p13, %p608_p5 }
  0x6d   : > { %618 = shalt.err (!%p615_p3)
}
  0x6e   : > { %463 = dma.vmem_to_hbm [thread:$0]  (%p994_p9), %s270_s9, 128, %s904_s23, %s245_s6  }
  0x6f   : > { %s224_s15 = scalar_lea.vmem [#allocation8], %s851_s21  ;;  %s933_s23 = scalar_lea.hbm %s985_s3, %s863_s29 }
  0x70   : > { %s297_s8 = sshll.u32 %s224_s15, 4  ;;  %s710_s21 = smov [#allocation8]   ;;  %s927_s8 = int_to_ptr.vmem [resolvable:$true] %s297_s8 }
  0x71   : > { %s619_s9 = scalar_lea.vmem %s927_s8, 128  ;;  %s623_s6 = sshll.u32 %s710_s21, 4  ;;  %s624_s6 = int_to_ptr.vmem [resolvable:$false] %s623_s6 }
  0x72   : > { %p620_p6 = scmp.ne.s32.totalorder %s927_s8, %s619_s9  ;;  %s625_s11 = scalar_lea.vmem %s624_s6, 256 }
  0x73   : > { %p626_p12 = scmp.lt.s32.totalorder %s927_s8, %s624_s6  ;;  %p627_p1 = scmp.lt.s32.totalorder %s625_s11, %s619_s9 }
  0x74   : > { %p621_p4 = pnand %p620_p6, %p994_p9 }
  0x75   : > { %p628_p2 = por %p627_p1, %p626_p12 }
  0x76   : > { %p622_p10 = pneg %p621_p4 }
  0x78   : > { %p629_p5 = pnand %p628_p2, %p622_p10 }
  0xcf   : > { %v234_v4 = vpop.xlane.xlu0 %233 }
  0xd0   : > { %v235_v5 = vrot.slane %v234_v4, 4 }
  0xd2   : > { %v236_v6 = vadd.f32 %v235_v5, %v234_v4 }
  0xd4   : > { %v237_v7 = vrot.slane %v236_v6, 2 }
  0xd6   : > { %v238_v8 = vadd.f32 %v237_v7, %v236_v6 }
  0xd8   : > { %v239_v9 = vrot.slane %v238_v8, 1 }
  0xda   : > { %v240_v10 = vadd.f32 %v239_v9, %v238_v8 }
  0xdc   : > { %459 = vpush %v240_v10 }
 0x10d   : > { %s460_s10 = spop %459 }
 0x10e   : > { %v242_v11 = vstv %s460_s10 }
 0x10f   : > { %243 = vst [vmem:[%s224_s15] sm:$0xff] %v242_v11 }
 0x110   : > { %632 = shalt.err (!%p629_p5)
}
 0x111   : > { %s633_s29 = scalar_lea.hbm %s933_s23, 128  ;;  %s637_s5 = scalar_lea.hbm %s985_s3, 256 }
 0x112   : > { %p634_p8 = scmp.ne.s32.totalorder %s933_s23, %s633_s29  ;;  %p638_p7 = scmp.lt.u32.totalorder %s933_s23, %s985_s3 }
 0x113   : > { %p639_p13 = scmp.lt.u32.totalorder %s637_s5, %s633_s29  ;;  %p641_p6 = scmp.lt.u32.totalorder %s633_s29, %s933_s23 }
 0x114   : > { %p635_p11 = pnand %p634_p8, %p994_p9 }
 0x115   : > { %p640_p3 = por %p639_p13, %p638_p7 }
 0x116   : > { %p636_p0 = pneg %p635_p11 }
 0x117   : > { %p642_p4 = por %p641_p6, %p640_p3 }
 0x119   : > { %p643_p10 = pnand %p642_p4, %p636_p0 }
 0x11b   : > { %646 = shalt.err (!%p643_p10)
}
 0x11c   : > { %465 = dma.vmem_to_hbm [thread:$0]  (%p994_p9), %s927_s8, 128, %s933_s23, %s876_s7  }
 0x11d PF: > { %s309_s15 = sand.u32 1, %s685_s12   ;;  %p995_p12 = scmp.ne.s32.totalorder %s990_s27, 0 }
 0x11e   : > { %p996_p1 = scmp.ge.s32.totalorder %s705_s17, 2  ;;  %s310_s10 = scalar_lea.sflag [#allocation4], %s309_s15 }
 0x120   : > { %p474_p2 = pnand %p996_p1, %p995_p12 }
 0x122   : > { %676 = dma.done.wait (!%p474_p2), %s310_s10, 128  }
 0x123   : > { %678 = vsyncadd (!%p474_p2), %s310_s10, 4294967168  ;;  %s318_s22 = sand.u32 1, %s441_s19  }
 0x124   : > { %s319_s24 = scalar_lea.sflag [#allocation7], %s318_s22 }
 0x125   : > { %680 = dma.done.wait (!%p474_p2), %s319_s24, 256  }
 0x126   : > { %682 = vsyncadd (!%p474_p2), %s319_s24, 4294967040  ;;  %s23_s17 = sadd.s32 1, %s705_s17   ;;  %s997_s12 = smov %s689_s13 }
 0x127   : > { %p20_p9 = scmp.ge.s32.totalorder %s23_s17, 4   ;;  %s998_s13 = smov %s693_s14 }
 0x128   : > { %s999_s14 = smov %s793_s26  ;;  %s1000_s15 = smov %s701_s16 }
 0x129   : > { %s1001_s16 = smov %s1003_s20  ;;  %22 = sbr.rel (!%p20_p9) target bundleno = 8 (0x8), region = 101 }
 0x130   :  { %333 = vsyncpa [#allocation3], 1 }
 0x131   :  { %335 = vsyncpa [#allocation3 + $0x1], 1 }
 0x132   :  { %336 = vsyncpa [#allocation4], 1 }
 0x133   :  { %338 = vsyncpa [#allocation4 + $0x1], 1 }
 0x134   :  { %339 = vsyncpa [#allocation7], 1 }
 0x135   :  { %341 = vsyncpa [#allocation7 + $0x1], 1 }

</bundles_post_ra>
